<compile_context>
chip_gen: v7x
topology: tpu7x:2x2x1
jax: 0.10.0
libtpu: 0.0.40
codegen_flags: <defaults>
</compile_context>

<pallas_src>
import functools

import jax
import jax.numpy as jnp
from jax.experimental import pallas as pl
from jax.experimental.pallas import tpu as pltpu


def _round_up(v, m):
    return (v + m - 1) // m * m


# ---------------------------------------------------------------------------
# Pallas kernel: channels-major tap-accumulated conv for one batch element
# ---------------------------------------------------------------------------
def _conv_kernel(x_ref, w_ref, b_ref, o_ref, *, kh, kw, dil, wp, L, oc8):
    # x_ref: (IC, FLATp)       zero-padded image, spatial flattened (h*Wp + w)
    # w_ref: (KH*KW, OC8, IC)  tap-major weight, OC padded to sublane multiple
    # b_ref: (OC8, 1)          f32 bias column
    # o_ref: (OC8, L)          lane-dense "wide" output (flattened (OH, Wp))
    acc = jnp.broadcast_to(b_ref[...], (oc8, L))          # f32, bias-initialized
    for i in range(kh):
        for j in range(kw):
            off = (i * wp + j) * dil                      # static lane offset
            xt = x_ref[:, off:off + L]                    # contiguous lane slice
            acc = acc + jnp.dot(w_ref[i * kw + j], xt,
                                preferred_element_type=jnp.float32)
    o_ref[...] = acc.astype(o_ref.dtype)


# ---------------------------------------------------------------------------
# SmoothConv2d forward (Conv2d semantics, NCHW in / NCHW out)
# ---------------------------------------------------------------------------
@functools.partial(
    jax.jit,
    static_argnames=("stride", "padding", "dilation", "groups", "compute_dtype"))
def smooth_conv2d(x, weight, bias, *, stride=1, padding=0, dilation=1,
                  groups=1, compute_dtype=jnp.float32):
    """x: (N, IC, H, W); weight: (OC, IC, KH, KW); bias: (OC,) -> (N, OC, OH, OW).

    compute_dtype=jnp.bfloat16 halves HBM traffic of the streamed input/weight
    on v6e/v7x (f32 accumulation is kept); default f32 for exact parity.
    """
    N, IC, H, W = x.shape
    OC, ICw, KH, KW = weight.shape
    if groups != 1 or ICw != IC:
        raise NotImplementedError("only groups=1 convolutions are supported")
    out_dtype = x.dtype

    Hp, Wp = H + 2 * padding, W + 2 * padding
    OH1 = Hp - dilation * (KH - 1)          # stride-1 output extents
    OW1 = Wp - dilation * (KW - 1)
    assert OH1 > 0 and OW1 > 0, "kernel does not fit in padded input"

    OC8 = _round_up(OC, 8)                  # output channels: sublane aligned only
    L = _round_up(OH1 * Wp, 128)            # lane-dense wide-output width
    max_off = (KH - 1) * dilation * Wp + (KW - 1) * dilation
    FLAT = Hp * Wp
    FLATp = _round_up(max(FLAT, max_off + L), 128)

    # Spatial zero-pad + flatten (H, W): row-major reshape, no transpose pass.
    x_flat = jnp.pad(x, ((0, 0), (0, 0), (padding, padding), (padding, padding)))
    x_flat = x_flat.reshape(N, IC, FLAT)
    x_flat = jnp.pad(x_flat, ((0, 0), (0, 0), (0, FLATp - FLAT)))
    x_flat = x_flat.astype(compute_dtype)

    # (OC, IC, KH, KW) -> (KH*KW, OC8, IC); zero rows of the OC pad contribute 0.
    w = jnp.transpose(weight, (2, 3, 0, 1)).reshape(KH * KW, OC, IC)
    w = jnp.pad(w, ((0, 0), (0, OC8 - OC), (0, 0))).astype(compute_dtype)

    b2 = jnp.pad(bias.astype(jnp.float32), (0, OC8 - OC)).reshape(OC8, 1)

    kern = functools.partial(_conv_kernel, kh=KH, kw=KW, dil=dilation,
                             wp=Wp, L=L, oc8=OC8)

    # Explicit VMEM budget: double-buffered input/output blocks + resident
    # weight/bias + accumulator headroom (tile padding to (8,128) included).
    isz = jnp.dtype(compute_dtype).itemsize
    osz = jnp.dtype(out_dtype).itemsize
    vmem_need = (2 * _round_up(IC, 8) * FLATp * isz
                 + KH * KW * OC8 * _round_up(IC, 128) * isz
                 + 2 * OC8 * L * osz
                 + 2 * OC8 * L * 4)
    vmem_limit = int(min(max(4 * vmem_need, 8 << 20), 48 << 20))

    out = pl.pallas_call(
        kern,
        out_shape=jax.ShapeDtypeStruct((N, OC8, L), out_dtype),
        grid_spec=pltpu.PrefetchScalarGridSpec(
            num_scalar_prefetch=0,
            grid=(N,),
            in_specs=[
                # one flattened padded image per grid step (squeezed batch dim)
                pl.BlockSpec((None, IC, FLATp), lambda n: (n, 0, 0)),
                # full (small) weight / bias, resident across steps
                pl.BlockSpec((KH * KW, OC8, IC), lambda n: (0, 0, 0)),
                pl.BlockSpec((OC8, 1), lambda n: (0, 0)),
            ],
            out_specs=pl.BlockSpec((None, OC8, L), lambda n: (n, 0, 0)),
        ),
        compiler_params=pltpu.CompilerParams(
            dimension_semantics=("parallel",),
            vmem_limit_bytes=vmem_limit),
    )(x_flat, w, b2)

    # Wide (OC8, padded OH1*Wp) block -> NCHW: drop pad lanes and the KW-1
    # garbage columns per row (small output-side slice, no transpose pass).
    out = out[:, :OC, :OH1 * Wp].reshape(N, OC, OH1, Wp)[:, :, :, :OW1]
    if stride > 1:
        out = out[:, :, ::stride, ::stride]
    return out


if __name__ == "__main__":
    # Small deterministic setup consistent with the module's __init__:
    # in_channels=4, out_channels=8, kernel_size=3, stride=1, padding=1.
    key = jax.random.PRNGKey(0)
    kx, kwt, kb = jax.random.split(key, 3)

    N, IC, H, W = 2, 4, 16, 16
    OC, KH, KW = 8, 3, 3
    stride, padding, dilation = 1, 1, 1

    x = jax.random.normal(kx, (N, IC, H, W), dtype=jnp.float32)
    weight = jax.random.normal(kwt, (OC, IC, KH, KW), dtype=jnp.float32) * 0.1
    bias = jax.random.normal(kb, (OC,), dtype=jnp.float32) * 0.1
    sl = jnp.zeros((1,), dtype=jnp.float32)  # smoothing scalar (unused, see TODO)

    ref = jax.lax.conv_general_dilated(
        x, weight, window_strides=(stride, stride),
        padding=((padding, padding), (padding, padding)),
        rhs_dilation=(dilation, dilation),
        dimension_numbers=("NCHW", "OIHW", "NCHW"),
    ) + bias.reshape(1, OC, 1, 1)

    # Exact-parity f32 path.
    out = smooth_conv2d(x, weight, bias, stride=stride, padding=padding,
                        dilation=dilation)
    jax.block_until_ready(out)
    assert out.shape == ref.shape == (N, OC, H, W)
    assert jnp.allclose(out, ref, atol=1e-4, rtol=1e-4)

    # bf16-streamed path (f32 accumulation) with bf16-appropriate tolerance.
    out_bf16 = smooth_conv2d(x, weight, bias, stride=stride, padding=padding,
                             dilation=dilation, compute_dtype=jnp.bfloat16)
    jax.block_until_ready(out_bf16)
    assert jnp.allclose(out_bf16, ref, atol=3e-2, rtol=3e-2)

    print("KERNEL_OK")
</pallas_src>

<mosaic_0001>
module attributes {stable_mosaic.version = 11 : i64} {
  func.func @_conv_kernel(%arg0: i32, %arg1: memref<1x4x512xf32, #tpu.memory_space<vmem>>, %arg2: memref<9x8x4xf32, #tpu.memory_space<vmem>>, %arg3: memref<8x1xf32, #tpu.memory_space<vmem>>, %arg4: memref<1x8x384xf32, #tpu.memory_space<vmem>>) attributes {dimension_semantics = [#tpu.dimension_semantics<parallel>], iteration_bounds = array<i64: 2>, scalar_prefetch = 0 : i64, scratch_operands = 0 : i64, tpu.core_type = #tpu.core_type<tc>, window_params = [{transform_indices = @transform_0, window_bounds = array<i64: 1, 4, 512>}, {pipeline_mode = #tpu.pipeline_mode<synchronous>, transform_indices = @transform_1, window_bounds = array<i64: 9, 8, 4>}, {pipeline_mode = #tpu.pipeline_mode<synchronous>, transform_indices = @transform_2, window_bounds = array<i64: 8, 1>}, {transform_indices = @transform_3, window_bounds = array<i64: 1, 8, 384>}]} {
    %c0 = arith.constant 0 : index
    %c0_0 = arith.constant 0 : index
    %0 = vector.load %arg3[%c0, %c0_0] : memref<8x1xf32, #tpu.memory_space<vmem>>, vector<8x1xf32>
    %1 = vector.shape_cast %0 : vector<8x1xf32> to vector<8x1xf32>
    %2 = vector.broadcast %1 : vector<8x1xf32> to vector<8x384xf32>
    %c0_1 = arith.constant 0 : index
    %c0_2 = arith.constant 0 : index
    %c0_3 = arith.constant 0 : index
    %3 = vector.load %arg1[%c0_1, %c0_2, %c0_3] : memref<1x4x512xf32, #tpu.memory_space<vmem>>, vector<1x4x384xf32>
    %4 = vector.shape_cast %3 : vector<1x4x384xf32> to vector<4x384xf32>
    %c0_4 = arith.constant 0 : index
    %c0_5 = arith.constant 0 : index
    %c0_6 = arith.constant 0 : index
    %5 = vector.load %arg2[%c0_4, %c0_5, %c0_6] : memref<9x8x4xf32, #tpu.memory_space<vmem>>, vector<1x8x4xf32>
    %6 = vector.shape_cast %5 : vector<1x8x4xf32> to vector<8x4xf32>
    %cst = arith.constant dense<0.000000e+00> : vector<8x384xf32>
    %7 = tpu.matmul %6, %4, %cst {dimension_numbers = #tpu.dot_dimension_numbers<[1], [0], [0], [1], [0, 0, 1, 1], [], []>} : vector<8x4xf32>, vector<4x384xf32>, vector<8x384xf32> -> vector<8x384xf32>
    %8 = arith.addf %2, %7 : vector<8x384xf32>
    %c0_7 = arith.constant 0 : index
    %c0_8 = arith.constant 0 : index
    %c1 = arith.constant 1 : index
    %9 = vector.load %arg1[%c0_7, %c0_8, %c1] : memref<1x4x512xf32, #tpu.memory_space<vmem>>, vector<1x4x384xf32>
    %10 = vector.shape_cast %9 : vector<1x4x384xf32> to vector<4x384xf32>
    %c1_9 = arith.constant 1 : index
    %c0_10 = arith.constant 0 : index
    %c0_11 = arith.constant 0 : index
    %11 = vector.load %arg2[%c1_9, %c0_10, %c0_11] : memref<9x8x4xf32, #tpu.memory_space<vmem>>, vector<1x8x4xf32>
    %12 = vector.shape_cast %11 : vector<1x8x4xf32> to vector<8x4xf32>
    %cst_12 = arith.constant dense<0.000000e+00> : vector<8x384xf32>
    %13 = tpu.matmul %12, %10, %cst_12 {dimension_numbers = #tpu.dot_dimension_numbers<[1], [0], [0], [1], [0, 0, 1, 1], [], []>} : vector<8x4xf32>, vector<4x384xf32>, vector<8x384xf32> -> vector<8x384xf32>
    %14 = arith.addf %8, %13 : vector<8x384xf32>
    %c0_13 = arith.constant 0 : index
    %c0_14 = arith.constant 0 : index
    %c2 = arith.constant 2 : index
    %15 = vector.load %arg1[%c0_13, %c0_14, %c2] : memref<1x4x512xf32, #tpu.memory_space<vmem>>, vector<1x4x384xf32>
    %16 = vector.shape_cast %15 : vector<1x4x384xf32> to vector<4x384xf32>
    %c2_15 = arith.constant 2 : index
    %c0_16 = arith.constant 0 : index
    %c0_17 = arith.constant 0 : index
    %17 = vector.load %arg2[%c2_15, %c0_16, %c0_17] : memref<9x8x4xf32, #tpu.memory_space<vmem>>, vector<1x8x4xf32>
    %18 = vector.shape_cast %17 : vector<1x8x4xf32> to vector<8x4xf32>
    %cst_18 = arith.constant dense<0.000000e+00> : vector<8x384xf32>
    %19 = tpu.matmul %18, %16, %cst_18 {dimension_numbers = #tpu.dot_dimension_numbers<[1], [0], [0], [1], [0, 0, 1, 1], [], []>} : vector<8x4xf32>, vector<4x384xf32>, vector<8x384xf32> -> vector<8x384xf32>
    %20 = arith.addf %14, %19 : vector<8x384xf32>
    %c0_19 = arith.constant 0 : index
    %c0_20 = arith.constant 0 : index
    %c18 = arith.constant 18 : index
    %21 = vector.load %arg1[%c0_19, %c0_20, %c18] : memref<1x4x512xf32, #tpu.memory_space<vmem>>, vector<1x4x384xf32>
    %22 = vector.shape_cast %21 : vector<1x4x384xf32> to vector<4x384xf32>
    %c3 = arith.constant 3 : index
    %c0_21 = arith.constant 0 : index
    %c0_22 = arith.constant 0 : index
    %23 = vector.load %arg2[%c3, %c0_21, %c0_22] : memref<9x8x4xf32, #tpu.memory_space<vmem>>, vector<1x8x4xf32>
    %24 = vector.shape_cast %23 : vector<1x8x4xf32> to vector<8x4xf32>
    %cst_23 = arith.constant dense<0.000000e+00> : vector<8x384xf32>
    %25 = tpu.matmul %24, %22, %cst_23 {dimension_numbers = #tpu.dot_dimension_numbers<[1], [0], [0], [1], [0, 0, 1, 1], [], []>} : vector<8x4xf32>, vector<4x384xf32>, vector<8x384xf32> -> vector<8x384xf32>
    %26 = arith.addf %20, %25 : vector<8x384xf32>
    %c0_24 = arith.constant 0 : index
    %c0_25 = arith.constant 0 : index
    %c19 = arith.constant 19 : index
    %27 = vector.load %arg1[%c0_24, %c0_25, %c19] : memref<1x4x512xf32, #tpu.memory_space<vmem>>, vector<1x4x384xf32>
    %28 = vector.shape_cast %27 : vector<1x4x384xf32> to vector<4x384xf32>
    %c4 = arith.constant 4 : index
    %c0_26 = arith.constant 0 : index
    %c0_27 = arith.constant 0 : index
    %29 = vector.load %arg2[%c4, %c0_26, %c0_27] : memref<9x8x4xf32, #tpu.memory_space<vmem>>, vector<1x8x4xf32>
    %30 = vector.shape_cast %29 : vector<1x8x4xf32> to vector<8x4xf32>
    %cst_28 = arith.constant dense<0.000000e+00> : vector<8x384xf32>
    %31 = tpu.matmul %30, %28, %cst_28 {dimension_numbers = #tpu.dot_dimension_numbers<[1], [0], [0], [1], [0, 0, 1, 1], [], []>} : vector<8x4xf32>, vector<4x384xf32>, vector<8x384xf32> -> vector<8x384xf32>
    %32 = arith.addf %26, %31 : vector<8x384xf32>
    %c0_29 = arith.constant 0 : index
    %c0_30 = arith.constant 0 : index
    %c20 = arith.constant 20 : index
    %33 = vector.load %arg1[%c0_29, %c0_30, %c20] : memref<1x4x512xf32, #tpu.memory_space<vmem>>, vector<1x4x384xf32>
    %34 = vector.shape_cast %33 : vector<1x4x384xf32> to vector<4x384xf32>
    %c5 = arith.constant 5 : index
    %c0_31 = arith.constant 0 : index
    %c0_32 = arith.constant 0 : index
    %35 = vector.load %arg2[%c5, %c0_31, %c0_32] : memref<9x8x4xf32, #tpu.memory_space<vmem>>, vector<1x8x4xf32>
    %36 = vector.shape_cast %35 : vector<1x8x4xf32> to vector<8x4xf32>
    %cst_33 = arith.constant dense<0.000000e+00> : vector<8x384xf32>
    %37 = tpu.matmul %36, %34, %cst_33 {dimension_numbers = #tpu.dot_dimension_numbers<[1], [0], [0], [1], [0, 0, 1, 1], [], []>} : vector<8x4xf32>, vector<4x384xf32>, vector<8x384xf32> -> vector<8x384xf32>
    %38 = arith.addf %32, %37 : vector<8x384xf32>
    %c0_34 = arith.constant 0 : index
    %c0_35 = arith.constant 0 : index
    %c36 = arith.constant 36 : index
    %39 = vector.load %arg1[%c0_34, %c0_35, %c36] : memref<1x4x512xf32, #tpu.memory_space<vmem>>, vector<1x4x384xf32>
    %40 = vector.shape_cast %39 : vector<1x4x384xf32> to vector<4x384xf32>
    %c6 = arith.constant 6 : index
    %c0_36 = arith.constant 0 : index
    %c0_37 = arith.constant 0 : index
    %41 = vector.load %arg2[%c6, %c0_36, %c0_37] : memref<9x8x4xf32, #tpu.memory_space<vmem>>, vector<1x8x4xf32>
    %42 = vector.shape_cast %41 : vector<1x8x4xf32> to vector<8x4xf32>
    %cst_38 = arith.constant dense<0.000000e+00> : vector<8x384xf32>
    %43 = tpu.matmul %42, %40, %cst_38 {dimension_numbers = #tpu.dot_dimension_numbers<[1], [0], [0], [1], [0, 0, 1, 1], [], []>} : vector<8x4xf32>, vector<4x384xf32>, vector<8x384xf32> -> vector<8x384xf32>
    %44 = arith.addf %38, %43 : vector<8x384xf32>
    %c0_39 = arith.constant 0 : index
    %c0_40 = arith.constant 0 : index
    %c37 = arith.constant 37 : index
    %45 = vector.load %arg1[%c0_39, %c0_40, %c37] : memref<1x4x512xf32, #tpu.memory_space<vmem>>, vector<1x4x384xf32>
    %46 = vector.shape_cast %45 : vector<1x4x384xf32> to vector<4x384xf32>
    %c7 = arith.constant 7 : index
    %c0_41 = arith.constant 0 : index
    %c0_42 = arith.constant 0 : index
    %47 = vector.load %arg2[%c7, %c0_41, %c0_42] : memref<9x8x4xf32, #tpu.memory_space<vmem>>, vector<1x8x4xf32>
    %48 = vector.shape_cast %47 : vector<1x8x4xf32> to vector<8x4xf32>
    %cst_43 = arith.constant dense<0.000000e+00> : vector<8x384xf32>
    %49 = tpu.matmul %48, %46, %cst_43 {dimension_numbers = #tpu.dot_dimension_numbers<[1], [0], [0], [1], [0, 0, 1, 1], [], []>} : vector<8x4xf32>, vector<4x384xf32>, vector<8x384xf32> -> vector<8x384xf32>
    %50 = arith.addf %44, %49 : vector<8x384xf32>
    %c0_44 = arith.constant 0 : index
    %c0_45 = arith.constant 0 : index
    %c38 = arith.constant 38 : index
    %51 = vector.load %arg1[%c0_44, %c0_45, %c38] : memref<1x4x512xf32, #tpu.memory_space<vmem>>, vector<1x4x384xf32>
    %52 = vector.shape_cast %51 : vector<1x4x384xf32> to vector<4x384xf32>
    %c8 = arith.constant 8 : index
    %c0_46 = arith.constant 0 : index
    %c0_47 = arith.constant 0 : index
    %53 = vector.load %arg2[%c8, %c0_46, %c0_47] : memref<9x8x4xf32, #tpu.memory_space<vmem>>, vector<1x8x4xf32>
    %54 = vector.shape_cast %53 : vector<1x8x4xf32> to vector<8x4xf32>
    %cst_48 = arith.constant dense<0.000000e+00> : vector<8x384xf32>
    %55 = tpu.matmul %54, %52, %cst_48 {dimension_numbers = #tpu.dot_dimension_numbers<[1], [0], [0], [1], [0, 0, 1, 1], [], []>} : vector<8x4xf32>, vector<4x384xf32>, vector<8x384xf32> -> vector<8x384xf32>
    %56 = arith.addf %50, %55 : vector<8x384xf32>
    %c0_49 = arith.constant 0 : index
    %c0_50 = arith.constant 0 : index
    %c0_51 = arith.constant 0 : index
    %57 = vector.load %arg4[%c0_49, %c0_50, %c0_51] : memref<1x8x384xf32, #tpu.memory_space<vmem>>, vector<1x8x384xf32>
    %58 = vector.shape_cast %57 : vector<1x8x384xf32> to vector<8x384xf32>
    %59 = vector.shape_cast %56 : vector<8x384xf32> to vector<1x8x384xf32>
    tpu.vector_store %arg4[%c0_49, %c0_50, %c0_51], %59 {strides = array<i32>} : memref<1x8x384xf32, #tpu.memory_space<vmem>>, vector<1x8x384xf32>,
    return
  }
  func.func @transform_0(%arg0: i32) -> (i32, i32, i32) {
    %c0_i32 = arith.constant 0 : i32
    %c0_i32_0 = arith.constant 0 : i32
    %c0_i32_1 = arith.constant 0 : i32
    return %arg0, %c0_i32, %c0_i32_0 : i32, i32, i32
  }
  func.func @transform_1(%arg0: i32) -> (i32, i32, i32) {
    %c0_i32 = arith.constant 0 : i32
    %c0_i32_0 = arith.constant 0 : i32
    %c0_i32_1 = arith.constant 0 : i32
    %c0_i32_2 = arith.constant 0 : i32
    return %c0_i32, %c0_i32_0, %c0_i32_1 : i32, i32, i32
  }
  func.func @transform_2(%arg0: i32) -> (i32, i32) {
    %c0_i32 = arith.constant 0 : i32
    %c0_i32_0 = arith.constant 0 : i32
    %c0_i32_1 = arith.constant 0 : i32
    return %c0_i32, %c0_i32_0 : i32, i32
  }
  func.func @transform_3(%arg0: i32) -> (i32, i32, i32) {
    %c0_i32 = arith.constant 0 : i32
    %c0_i32_0 = arith.constant 0 : i32
    %c0_i32_1 = arith.constant 0 : i32
    return %arg0, %c0_i32, %c0_i32_0 : i32, i32, i32
  }
}

</mosaic_0001>

<bundles_post_ra>
// kernel: smooth_conv2d.1
= control target key start
LH: loop header
LB: loop body
LE: loop exit
PB: predicated region body
PF: predicated region fallthrough
CT: control target
= control target key end

     0   :  { %s2004_s12 = smov 0   ;;  %s2136_s0 = inlined_call_operand.vmem [shape: f32[2,4,512], index: 0, kind: input, shape index: {}]   ;;  %s2137_s1 = inlined_call_operand.vmem [shape: f32[9,8,4], index: 1, kind: input, shape index: {}]   ;;  %s2138_s2 = inlined_call_operand.vmem [shape: f32[8,1], index: 2, kind: input, shape index: {}]   ;;  %s2139_s3 = inlined_call_operand.vmem [shape: f32[2,8,384], index: 3, kind: output, shape index: {}]  }
   0x1 LB: > { %s1780_s13 = sadd.s32 4294967295, %s1971_s12   ;;  %p1784_p0 = scmp.ge.s32.totalorder %s1971_s12, 1  ;;  %s1971_s12 = sphi %s2004_s12, %s13_s12  }
   0x2   : > { %p137_p1 = scmp.lt.s32.totalorder %s1971_s12, 3 }
   0x4   : > { %p138_p2 = pnand %p1784_p0, %p137_p1 }
   0x5   : > { %p161_p3 = scmp.lt.s32.totalorder (!%p138_p2), %s1780_s13, 1  ;;  %v1973_v0 = vmov (!%p138_p2), 0.0   ;;  %vm1974_vm0 = vmmov (!%p138_p2), 0   ;;  %vm187_vm1 = vcmask (!%p138_p2), 1043456   ;;  %v179_v1 = vld [vmem:[%s2137_s1] sm:$0xff] (!%p138_p2)  ;;  %vm183_vm2 = vcmask (!%p138_p2), 31744  }
   0x6   : > { %141 = sbr.rel (%p138_p2) target bundleno = 414 (0x19e), region = 32  ;;  %1862 = vmatprep.subr.mxu1 (!%p138_p2), %v1973_v0  ;;  %1864 = vmatprep.mubr.msk.f32.mxu1 (!%p138_p2), %vm1974_vm0, %v1973_v0  ;;  %s1975_s20 = smov (!%p138_p2), 127   ;;  %v1982_v7 = vmov (!%p138_p2), 0   ;;  %v171_v8 = vld [vmem:[%s2138_s2] sm:$0xff] (!%p138_p2)  ;;  %vm354_vm3 = vcmask (!%p138_p2), 1039360   ;;  %v1793_v13 = vld [vmem:[%s2137_s1 + $0x8] sm:$0xff] (!%p138_p2) }
   0x7   : > { %258 = vmatprep.mubr.f32.mxu0 (!%p138_p2), %v1973_v0  ;;  %s1976_s21 = smov (!%p138_p2), 126   ;;  %s1977_s22 = smov (!%p138_p2), 110   ;;  %1962 = vset.pattern.permute.xlu0 (!%p138_p2), %v1982_v7  ;;  %vm527_vm4 = vcmask (!%p138_p2), 1031168   ;;  %v1799_v23 = vld [vmem:[%s2137_s1 + $0x10] sm:$0xff] (!%p138_p2)  ;;  %vm700_vm5 = vcmask (!%p138_p2), 900096   ;;  %v1805_v31 = vld [vmem:[%s2137_s1 + $0x18] sm:$0xff] (!%p138_p2) }
   0x8   : > { %s1978_s23 = smov (!%p138_p2), 109   ;;  %s1979_s24 = smov (!%p138_p2), 108   ;;  %vm873_vm6 = vcmask (!%p138_p2), 891904   ;;  %v1811_v39 = vld [vmem:[%s2137_s1 + $0x20] sm:$0xff] (!%p138_p2)  ;;  %vm1046_vm7 = vcmask (!%p138_p2), 883712   ;;  %v1817_v47 = vld [vmem:[%s2137_s1 + $0x28] sm:$0xff] (!%p138_p2) }
   0x9   : > { %s1980_s25 = smov (!%p138_p2), 92   ;;  %s1981_s26 = smov (!%p138_p2), 91   ;;  %vm1219_vm8 = vcmask (!%p138_p2), 752640   ;;  %v1823_v55 = vld [vmem:[%s2137_s1 + $0x30] sm:$0xff] (!%p138_p2)  ;;  %vm1392_vm9 = vcmask (!%p138_p2), 744448   ;;  %v1829_v63 = vld [vmem:[%s2137_s1 + $0x38] sm:$0xff] (!%p138_p2) }
   0xa   : > { %s1983_s27 = smov (!%p138_p2), 90   ;;  %vm1565_vm10 = vcmask (!%p138_p2), 736256  }
   0xd   : > { %s2141_s13 = smov (!%p161_p3, %s1780_s13), 1 }
   0xe   : > { %s1843_s14 = sshll.u32 %s2141_s13, 4 }
   0xf   : > { %s165_s17 = scalar_lea.vmem %s2136_s0, %s1843_s14 }
  0x10   : > { %v338_v2 = vld [vmem:[%s165_s17] sm:$0xff]  ;;  %v339_v3 = vld [vmem:[%s165_s17 + $0x8] sm:$0xff] }
  0x11   : > { %v178_v4 = vld [vmem:[%s165_s17 + $0x8] sm:$0xf]  ;;  %346 = vrot.lane.b32.xlu1 %v338_v2, %s1975_s20  ;;  %v344_v5 = vcombine.high %v338_v2, %v338_v2  ;;  %v345_v6 = vcombine.high %v339_v3, %v339_v3 }
  0x12   : > { %1863 = vmatpush3.msk.msra.mxu1 %vm187_vm1, %v178_v4 }
  0x13   : > { %1865 = vmatmul.mubr.msk.f32.vlgmr.msra.gmra.mrb[0].mxu1 %vm183_vm2, %v179_v1  ;;  %1867 = vmatprep.subr.mxu1 %v1973_v0 }
  0x14   : > { %348 = vrot.lane.b32.xlu0 %v344_v5, %s1975_s20  ;;  %1788 = vmatprep.subr.msk.mxu0 %vm187_vm1, %v344_v5 }
  0x15   : > { %1789 = vmatpush1.msk.msra.mxu0 %vm187_vm1, %v338_v2  ;;  %1869 = vmatprep.mubr.msk.f32.mxu1 %vm1974_vm0, %v1973_v0 }
  0x16   : > { %352 = vrot.lane.b32.xlu1 %v345_v6, %s1975_s20  ;;  %1790 = vmatmul.mubr.msk.f32.vlgmr.msra.gmra.mrb[0].mxu0 %vm183_vm2, %v179_v1 }
  0x17   : > { %431 = vmatprep.mubr.f32.mxu0 %v1973_v0 }
  0x18   : > { %350 = vrot.lane.b32.xlu0 %v339_v3, %s1975_s20 }
  0x1a   : > { %523 = vrot.lane.b32.xlu1 %v339_v3, %s1976_s21 }
  0x1c   : > { %521 = vrot.lane.b32.xlu0 %v344_v5, %s1976_s21 }
  0x1e   : > { %525 = vrot.lane.b32.xlu1 %v345_v6, %s1976_s21 }
  0x20   : > { %519 = vrot.lane.b32.xlu0 %v338_v2, %s1976_s21  ;;  %s1942_s21 = smul.u32 24, %s2141_s13 }
  0x22   : > { %696 = vrot.lane.b32.xlu1 %v339_v3, %s1977_s22 }
  0x24   : > { %694 = vrot.lane.b32.xlu0 %v344_v5, %s1977_s22 }
  0x26   : > { %698 = vrot.lane.b32.xlu1 %v345_v6, %s1977_s22 }
  0x28   : > { %692 = vrot.lane.b32.xlu0 %v338_v2, %s1977_s22 }
  0x2a   : > { %869 = vrot.lane.b32.xlu1 %v339_v3, %s1978_s23 }
  0x2c   : > { %867 = vrot.lane.b32.xlu0 %v344_v5, %s1978_s23 }
  0x2e   : > { %871 = vrot.lane.b32.xlu1 %v345_v6, %s1978_s23 }
  0x30   : > { %865 = vrot.lane.b32.xlu0 %v338_v2, %s1978_s23 }
  0x32   : > { %1042 = vrot.lane.b32.xlu1 %v339_v3, %s1979_s24 }
  0x34   : > { %1040 = vrot.lane.b32.xlu0 %v344_v5, %s1979_s24 }
  0x36   : > { %1044 = vrot.lane.b32.xlu1 %v345_v6, %s1979_s24 }
  0x38   : > { %1038 = vrot.lane.b32.xlu0 %v338_v2, %s1979_s24  ;;  %s170_s24 = scalar_lea.vmem %s2139_s3, %s1942_s21 }
  0x3a   : > { %1215 = vrot.lane.b32.xlu1 %v339_v3, %s1980_s25 }
  0x3c   : > { %1213 = vrot.lane.b32.xlu0 %v344_v5, %s1980_s25 }
  0x3e   : > { %1217 = vrot.lane.b32.xlu1 %v345_v6, %s1980_s25 }
  0x40   : > { %1211 = vrot.lane.b32.xlu0 %v338_v2, %s1980_s25 }
  0x42   : > { %1388 = vrot.lane.b32.xlu1 %v339_v3, %s1981_s26 }
  0x44   : > { %1386 = vrot.lane.b32.xlu0 %v344_v5, %s1981_s26 }
  0x46   : > { %1390 = vrot.lane.b32.xlu1 %v345_v6, %s1981_s26 }
  0x48   : > { %1384 = vrot.lane.b32.xlu0 %v338_v2, %s1981_s26 }
  0x4a   : > { %1561 = vrot.lane.b32.xlu1 %v339_v3, %s1983_s27 }
  0x4c   : > { %1559 = vrot.lane.b32.xlu0 %v344_v5, %s1983_s27 }
  0x4e   : > { %1563 = vrot.lane.b32.xlu1 %v345_v6, %s1983_s27 }
  0x50   : > { %1557 = vrot.lane.b32.xlu0 %v338_v2, %s1983_s27 }
  0x54   : > { %174 = vperm.xlu0 %1962, %v171_v8   ;;  %v1835_v8 = vld [vmem:[%s2137_s1 + $0x40] sm:$0xff] }
  0x83   : > { %v347_v9 = vpop.permute.xlu1 %346 }
  0x86   : > { %v349_v10 = vpop.permute.xlu0 %348 }
  0x87   : > { %v355_v16 = vsel %vm354_vm3, %v347_v9, %v349_v10 }
  0x88   : > { %v353_v11 = vpop.permute.xlu1 %352 }
  0x8a   : > { %v351_v12 = vpop.permute.xlu0 %350 }
  0x8b   : > { %v356_v14 = vsel %vm354_vm3, %v349_v10, %v351_v12  ;;  %v357_v15 = vsel %vm354_vm3, %v351_v12, %v353_v11 }
  0x8c   : > { %v524_v17 = vpop.permute.xlu1 %523  ;;  %1794 = vmatprep.subr.msk.mxu0 %vm187_vm1, %v356_v14  ;;  %1868 = vmatpush3.msk.msra.mxu1 %vm187_vm1, %v357_v15 }
  0x8d   : > { %1795 = vmatpush1.msk.msra.mxu0 %vm187_vm1, %v355_v16  ;;  %1870 = vmatmul.mubr.msk.f32.vlgmr.msra.gmra.mrb[0].mxu1 %vm183_vm2, %v1793_v13 }
  0x8e   : > { %v522_v18 = vpop.permute.xlu0 %521  ;;  %1796 = vmatmul.mubr.msk.f32.vlgmr.msra.gmra.mrb[0].mxu0 %vm183_vm2, %v1793_v13  ;;  %1872 = vmatprep.subr.mxu1 %v1973_v0 }
  0x8f   : > { %v529_v19 = vsel %vm527_vm4, %v522_v18, %v524_v17  ;;  %1874 = vmatprep.mubr.msk.f32.mxu1 %vm1974_vm0, %v1973_v0  ;;  %604 = vmatprep.mubr.f32.mxu0 %v1973_v0 }
  0x90   : > { %v526_v20 = vpop.permute.xlu1 %525  ;;  %1800 = vmatprep.subr.msk.mxu0 %vm187_vm1, %v529_v19 }
  0x91   : > { %v530_v21 = vsel %vm527_vm4, %v524_v17, %v526_v20 }
  0x92   : > { %v520_v22 = vpop.permute.xlu0 %519  ;;  %1873 = vmatpush3.msk.msra.mxu1 %vm187_vm1, %v530_v21 }
  0x93   : > { %v528_v24 = vsel %vm527_vm4, %v520_v22, %v522_v18  ;;  %1877 = vmatprep.subr.mxu1 %v1973_v0 }
  0x94   : > { %v697_v25 = vpop.permute.xlu1 %696  ;;  %1801 = vmatpush1.msk.msra.mxu0 %vm187_vm1, %v528_v24 }
  0x95   : > { %1875 = vmatmul.mubr.msk.f32.vlgmr.msra.gmra.mrb[0].mxu1 %vm183_vm2, %v1799_v23 }
  0x96   : > { %v695_v26 = vpop.permute.xlu0 %694  ;;  %1802 = vmatmul.mubr.msk.f32.vlgmr.msra.gmra.mrb[0].mxu0 %vm183_vm2, %v1799_v23  ;;  %1879 = vmatprep.mubr.msk.f32.mxu1 %vm1974_vm0, %v1973_v0 }
  0x97   : > { %v702_v27 = vsel %vm700_vm5, %v695_v26, %v697_v25  ;;  %777 = vmatprep.mubr.f32.mxu0 %v1973_v0 }
  0x98   : > { %v699_v28 = vpop.permute.xlu1 %698  ;;  %1806 = vmatprep.subr.msk.mxu0 %vm187_vm1, %v702_v27 }
  0x99   : > { %v703_v29 = vsel %vm700_vm5, %v697_v25, %v699_v28 }
  0x9a   : > { %v693_v30 = vpop.permute.xlu0 %692  ;;  %1878 = vmatpush3.msk.msra.mxu1 %vm187_vm1, %v703_v29 }
  0x9b   : > { %v701_v32 = vsel %vm700_vm5, %v693_v30, %v695_v26  ;;  %1882 = vmatprep.subr.mxu1 %v1973_v0 }
  0x9c   : > { %v870_v33 = vpop.permute.xlu1 %869  ;;  %1807 = vmatpush1.msk.msra.mxu0 %vm187_vm1, %v701_v32 }
  0x9d   : > { %1880 = vmatmul.mubr.msk.f32.vlgmr.msra.gmra.mrb[0].mxu1 %vm183_vm2, %v1805_v31 }
  0x9e   : > { %v868_v34 = vpop.permute.xlu0 %867  ;;  %1808 = vmatmul.mubr.msk.f32.vlgmr.msra.gmra.mrb[0].mxu0 %vm183_vm2, %v1805_v31  ;;  %1884 = vmatprep.mubr.msk.f32.mxu1 %vm1974_vm0, %v1973_v0 }
  0x9f   : > { %v875_v35 = vsel %vm873_vm6, %v868_v34, %v870_v33  ;;  %950 = vmatprep.mubr.f32.mxu0 %v1973_v0 }
  0xa0   : > { %v872_v36 = vpop.permute.xlu1 %871  ;;  %1812 = vmatprep.subr.msk.mxu0 %vm187_vm1, %v875_v35 }
  0xa1   : > { %v876_v37 = vsel %vm873_vm6, %v870_v33, %v872_v36 }
  0xa2   : > { %v866_v38 = vpop.permute.xlu0 %865  ;;  %1883 = vmatpush3.msk.msra.mxu1 %vm187_vm1, %v876_v37 }
  0xa3   : > { %v874_v40 = vsel %vm873_vm6, %v866_v38, %v868_v34  ;;  %1887 = vmatprep.subr.mxu1 %v1973_v0 }
  0xa4   : > { %v1043_v41 = vpop.permute.xlu1 %1042  ;;  %1813 = vmatpush1.msk.msra.mxu0 %vm187_vm1, %v874_v40 }
  0xa5   : > { %1885 = vmatmul.mubr.msk.f32.vlgmr.msra.gmra.mrb[0].mxu1 %vm183_vm2, %v1811_v39 }
  0xa6   : > { %v1041_v42 = vpop.permute.xlu0 %1040  ;;  %1814 = vmatmul.mubr.msk.f32.vlgmr.msra.gmra.mrb[0].mxu0 %vm183_vm2, %v1811_v39  ;;  %1889 = vmatprep.mubr.msk.f32.mxu1 %vm1974_vm0, %v1973_v0 }
  0xa7   : > { %v1048_v43 = vsel %vm1046_vm7, %v1041_v42, %v1043_v41  ;;  %1123 = vmatprep.mubr.f32.mxu0 %v1973_v0 }
  0xa8   : > { %v1045_v44 = vpop.permute.xlu1 %1044  ;;  %1818 = vmatprep.subr.msk.mxu0 %vm187_vm1, %v1048_v43 }
  0xa9   : > { %v1049_v45 = vsel %vm1046_vm7, %v1043_v41, %v1045_v44 }
  0xaa   : > { %v1039_v46 = vpop.permute.xlu0 %1038  ;;  %1888 = vmatpush3.msk.msra.mxu1 %vm187_vm1, %v1049_v45 }
  0xab   : > { %v1047_v48 = vsel %vm1046_vm7, %v1039_v46, %v1041_v42  ;;  %1892 = vmatprep.subr.mxu1 %v1973_v0 }
  0xac   : > { %v1216_v49 = vpop.permute.xlu1 %1215  ;;  %1819 = vmatpush1.msk.msra.mxu0 %vm187_vm1, %v1047_v48 }
  0xad   : > { %1890 = vmatmul.mubr.msk.f32.vlgmr.msra.gmra.mrb[0].mxu1 %vm183_vm2, %v1817_v47 }
  0xae   : > { %v1214_v50 = vpop.permute.xlu0 %1213  ;;  %1820 = vmatmul.mubr.msk.f32.vlgmr.msra.gmra.mrb[0].mxu0 %vm183_vm2, %v1817_v47  ;;  %1894 = vmatprep.mubr.msk.f32.mxu1 %vm1974_vm0, %v1973_v0 }
  0xaf   : > { %v1221_v51 = vsel %vm1219_vm8, %v1214_v50, %v1216_v49  ;;  %1296 = vmatprep.mubr.f32.mxu0 %v1973_v0 }
  0xb0   : > { %v1218_v52 = vpop.permute.xlu1 %1217  ;;  %1824 = vmatprep.subr.msk.mxu0 %vm187_vm1, %v1221_v51 }
  0xb1   : > { %v1222_v53 = vsel %vm1219_vm8, %v1216_v49, %v1218_v52 }
  0xb2   : > { %v1212_v54 = vpop.permute.xlu0 %1211  ;;  %1893 = vmatpush3.msk.msra.mxu1 %vm187_vm1, %v1222_v53 }
  0xb3   : > { %v1220_v56 = vsel %vm1219_vm8, %v1212_v54, %v1214_v50  ;;  %1897 = vmatprep.subr.mxu1 %v1973_v0 }
  0xb4   : > { %v1389_v57 = vpop.permute.xlu1 %1388  ;;  %1825 = vmatpush1.msk.msra.mxu0 %vm187_vm1, %v1220_v56 }
  0xb5   : > { %1895 = vmatmul.mubr.msk.f32.vlgmr.msra.gmra.mrb[0].mxu1 %vm183_vm2, %v1823_v55 }
  0xb6   : > { %v1387_v58 = vpop.permute.xlu0 %1386  ;;  %1826 = vmatmul.mubr.msk.f32.vlgmr.msra.gmra.mrb[0].mxu0 %vm183_vm2, %v1823_v55  ;;  %1899 = vmatprep.mubr.msk.f32.mxu1 %vm1974_vm0, %v1973_v0 }
  0xb7   : > { %v1394_v59 = vsel %vm1392_vm9, %v1387_v58, %v1389_v57  ;;  %1469 = vmatprep.mubr.f32.mxu0 %v1973_v0 }
  0xb8   : > { %v1391_v60 = vpop.permute.xlu1 %1390  ;;  %1830 = vmatprep.subr.msk.mxu0 %vm187_vm1, %v1394_v59 }
  0xb9   : > { %v1395_v61 = vsel %vm1392_vm9, %v1389_v57, %v1391_v60 }
  0xba   : > { %v1385_v62 = vpop.permute.xlu0 %1384  ;;  %1898 = vmatpush3.msk.msra.mxu1 %vm187_vm1, %v1395_v61 }
  0xbb   : > { %v1393_v1 = vsel %vm1392_vm9, %v1385_v62, %v1387_v58  ;;  %1902 = vmatprep.subr.mxu1 %v1973_v0 }
  0xbc   : > { %v1562_v2 = vpop.permute.xlu1 %1561  ;;  %1831 = vmatpush1.msk.msra.mxu0 %vm187_vm1, %v1393_v1 }
  0xbd   : > { %1900 = vmatmul.mubr.msk.f32.vlgmr.msra.gmra.mrb[0].mxu1 %vm183_vm2, %v1829_v63 }
  0xbe   : > { %v1560_v3 = vpop.permute.xlu0 %1559  ;;  %1832 = vmatmul.mubr.msk.f32.vlgmr.msra.gmra.mrb[0].mxu0 %vm183_vm2, %v1829_v63  ;;  %1904 = vmatprep.mubr.msk.f32.mxu1 %vm1974_vm0, %v1973_v0 }
  0xbf   : > { %v1567_v4 = vsel %vm1565_vm10, %v1560_v3, %v1562_v2  ;;  %1642 = vmatprep.mubr.f32.mxu0 %v1973_v0 }
  0xc0   : > { %v1564_v5 = vpop.permute.xlu1 %1563  ;;  %1836 = vmatprep.subr.msk.mxu0 %vm187_vm1, %v1567_v4 }
  0xc1   : > { %v1568_v6 = vsel %vm1565_vm10, %v1562_v2, %v1564_v5 }
  0xc2   : > { %v1558_v7 = vpop.permute.xlu0 %1557  ;;  %1903 = vmatpush3.msk.msra.mxu1 %vm187_vm1, %v1568_v6 }
  0xc3   : > { %v1566_v9 = vsel %vm1565_vm10, %v1558_v7, %v1560_v3 }
  0xc4   : > { %1837 = vmatpush1.msk.msra.mxu0 %vm187_vm1, %v1566_v9 }
  0xc5   : > { %1905 = vmatmul.mubr.msk.f32.vlgmr.msra.gmra.mrb[0].mxu1 %vm183_vm2, %v1835_v8 }
  0xc6   : > { %1838 = vmatmul.mubr.msk.f32.vlgmr.msra.gmra.mrb[0].mxu0 %vm183_vm2, %v1835_v8 }
  0xd3   : > { %v175_v0 = vpop.permute.xlu0 %174 }
 0x198   : > { %v1715_v10 = vpop.f32.mrb[0].mxu1 }
 0x199   : > { %v1909_v11 = vadd.f32 %v1715_v10, %v175_v0  ;;  %v1644_v12 = vpop.f32.mrb[0].mxu0  ;;  %v1906_v13 = vpop.f32.mrb[1].mxu1 }
 0x19a   : > { %v1907_v14 = vadd.f32 %v1644_v12, %v175_v0  ;;  %v1646_v15 = vpop.f32.mrb[1].mxu0 }
 0x19b   : > { %1724 = vst [vmem:[%s170_s24 + $0x10] sm:$0xff] %v1909_v11  ;;  %v1908_v16 = vadd.f32 %v1646_v15, %v175_v0 }
 0x19c   : > { %1722 = vst [vmem:[%s170_s24] sm:$0xff] %v1907_v14 }
 0x19d   : > { %1723 = vst [vmem:[%s170_s24 + $0x8] sm:$0xff] %v1908_v16 }
 0x19e PF: > { %s13_s12 = sadd.s32 1, %s1971_s12  }
 0x19f   : > { %p10_p4 = scmp.ge.s32.totalorder %s13_s12, 4  }
 0x1a1   :  { %12 = sbr.rel (!%p10_p4) target bundleno = 1 (0x1), region = 70 }

</bundles_post_ra>
